<compile_context>
chip_gen: v7x
topology: tpu7x:2x2x1
jax: 0.10.0
libtpu: 0.0.40
codegen_flags: <defaults>
</compile_context>

<pallas_src>
import functools
import inspect

import jax
import jax.numpy as jnp
from jax import lax
from jax.experimental import pallas as pl
from jax.experimental.pallas import tpu as pltpu


# ---------------------------------------------------------------------------
# One-time, module-level configuration (chip generation, feature support).
# ---------------------------------------------------------------------------
def _device_kind():
    try:
        return jax.devices()[0].device_kind.lower()
    except Exception:
        return ""


_KIND = _device_kind()
_IS_V5 = "v5" in _KIND
_IS_V7 = "v7" in _KIND

# v6e/v7x have a bf16 EUP path: exp over the (S, S) scores is ~2x faster and the
# largest VMEM intermediate is halved.  v5e has no bf16 VALU/EUP: keep f32.
_EXP_DTYPE = jnp.float32 if _IS_V5 else jnp.bfloat16
_EXP_BYTES = 4 if _IS_V5 else 2

# Flattened-row target for the batch tile and the scoped-VMEM cap (kept below
# physical VMEM: 64 MiB on v7x, 128 MiB on v5e/v6e).
_TARGET_ROWS = 1024 if _IS_V7 else 2048
_VMEM_CAP = (56 << 20) if _IS_V7 else (100 << 20)


def _pipeline_mode_supported():
    """Construction-time check (no compile/execute probe) for BlockSpec(pipeline_mode=)."""
    try:
        return (hasattr(pl, "Buffered")
                and "pipeline_mode" in inspect.signature(pl.BlockSpec).parameters)
    except Exception:
        return False


_HAS_PIPELINE_MODE = _pipeline_mode_supported()


# ---------------------------------------------------------------------------
# Kernel
# ---------------------------------------------------------------------------
def _bi_attention_kernel(x_ref, w1_ref, b1_ref, g_ref, beta_ref, w2_ref, b2_ref,
                         out_ref, *, exp_dtype, transposed_out):
    bt, s, f = x_ref.shape
    h_dim = w1_ref.shape[1]
    eps = 1e-5

    # ---- linear: one tall (Bt*S, F) @ (F, H) matmul (MXU-friendly M). ----
    # The (Bt,S,F)<->(Bt*S,F) / (Bt*S,H)<->(Bt,S,H) reshapes are view-only when
    # S % 8 == 0 (f32 sublane tiling); otherwise they materialize small copies
    # (still correct).
    x2 = x_ref[...].reshape(bt * s, f).astype(jnp.bfloat16)
    w1 = w1_ref[...].astype(jnp.bfloat16)
    h2 = jnp.dot(x2, w1, preferred_element_type=jnp.float32) + b1_ref[...]
    h = h2.reshape(bt, s, h_dim)                                  # (Bt, S, H) f32
    h_bf = h.astype(jnp.bfloat16)

    # ---- self-attention, deferred softmax normalization. ----
    # scores = h @ h^T via a batched dot_general (no explicit XLU transpose).
    scores = lax.dot_general(h_bf, h_bf, (((2,), (2,)), ((0,), (0,))),
                             preferred_element_type=jnp.float32)  # (Bt, S, S)
    m = jnp.max(scores, axis=-1, keepdims=True)
    # Unnormalized exp weights; the (S,S)-sized normalization multiply + cast
    # are deferred to the (S,H)-sized result below.
    e = jnp.exp((scores - m).astype(exp_dtype))
    denom = jnp.sum(e, axis=-1, keepdims=True, dtype=jnp.float32)
    attended = lax.dot_general(e.astype(jnp.bfloat16), h_bf,
                               (((2,), (1,)), ((0,), (0,))),
                               preferred_element_type=jnp.float32)  # (Bt, S, H)
    attended = attended * pl.reciprocal(denom, approx=True)

    # ---- residual + LayerNorm (centered two-pass variance). ----
    y = attended + h
    mean = jnp.mean(y, axis=-1, keepdims=True)
    d = y - mean
    var = jnp.mean(d * d, axis=-1, keepdims=True)
    y_norm = d * lax.rsqrt(var + eps) * g_ref[...] + beta_ref[...]

    # ---- final fc. ----
    y2 = y_norm.reshape(bt * s, h_dim).astype(jnp.bfloat16)
    w2 = w2_ref[...].astype(jnp.bfloat16)
    if transposed_out:
        # (Cp8, H) x (Bt*S, H) contracting H -> (Cp8, Bt*S): the long Bt*S axis
        # is lane-dense (unmasked vst) and HBM writeback is Cp8 lanes, not 128.
        out = lax.dot_general(w2, y2, (((1,), (1,)), ((), ())),
                              preferred_element_type=jnp.float32)
        out_ref[...] = (out + b2_ref[...]).astype(out_ref.dtype)
    else:
        # Compact (B, S, C) output; masked stores only on tiny shapes.
        out = jnp.dot(y2, w2, preferred_element_type=jnp.float32) + b2_ref[...]
        out_ref[...] = out.reshape(bt, s, w2.shape[-1]).astype(out_ref.dtype)


# ---------------------------------------------------------------------------
# Planning helpers
# ---------------------------------------------------------------------------
def _round_up(n, m):
    return ((n + m - 1) // m) * m


def _vmem_bytes(bt, s, f, h, out_lanes):
    """Rough per-grid-step VMEM footprint (tile choice + vmem_limit_bytes)."""
    x_blk = 2 * bt * s * f * 4                       # double-buffered input block
    out_blk = 2 * bt * s * out_lanes * 4             # double-buffered output block
    weights = 2 * (f * h + h * out_lanes + 3 * h + out_lanes) * 4
    scores = bt * s * s * (4 + _EXP_BYTES + 2)       # scores f32 + e + bf16 operand
    rows = bt * s * h * 48                           # h/h_bf/attended/y/y_norm/casts
    return x_blk + out_blk + weights + scores + rows + (4 << 20)


def _plan(B, S, F, H, C, Cp8):
    """Pick the batch tile, output layout and scoped-VMEM limit."""
    bt = 1
    for d in range(1, B + 1):
        if B % d:
            continue
        if d * S > _TARGET_ROWS:
            continue
        if B > 1 and B // d < 2:
            # Keep >= 2 grid steps: v7x megacore sharding + DMA/compute overlap.
            continue
        if _vmem_bytes(d, S, F, H, Cp8) > _VMEM_CAP:
            continue
        bt = d
    grid = B // bt
    # Lane-dense transposed output requires the Bt*S block axis to be a legal
    # block (multiple of 128 lanes, or the full extent when grid == 1).
    transposed = ((bt * S) % 128 == 0) or grid == 1
    out_lanes = Cp8 if transposed else C
    vmem_limit = int(min(max(_vmem_bytes(bt, S, F, H, out_lanes), 32 << 20),
                         _VMEM_CAP))
    return bt, transposed, vmem_limit


def _build_pallas_call(B, S, F, H, C, Cp8, bt, transposed, vmem_limit):
    kernel = functools.partial(_bi_attention_kernel,
                               exp_dtype=_EXP_DTYPE,
                               transposed_out=transposed)

    def invariant(shape):
        # Grid-invariant operands: single buffer when supported, else default.
        kwargs = {}
        if _HAS_PIPELINE_MODE:
            kwargs["pipeline_mode"] = pl.Buffered(1)
        return pl.BlockSpec(shape, lambda b: (0,) * len(shape), **kwargs)

    in_specs = [
        pl.BlockSpec((bt, S, F), lambda b: (b, 0, 0)),   # x block
        invariant((F, H)),                               # linear weight
        invariant((1, H)),                               # linear bias
        invariant((1, H)),                               # layernorm gamma
        invariant((1, H)),                               # layernorm beta
    ]
    if transposed:
        in_specs += [invariant((Cp8, H)),                # fc weight (transposed, row-padded)
                     invariant((Cp8, 1))]                # fc bias   (row-padded)
        out_shape = jax.ShapeDtypeStruct((Cp8, B * S), jnp.float32)
        out_spec = pl.BlockSpec((Cp8, bt * S), lambda b: (0, b))
    else:
        in_specs += [invariant((H, C)),                  # fc weight
                     invariant((1, C))]                  # fc bias
        out_shape = jax.ShapeDtypeStruct((B, S, C), jnp.float32)
        out_spec = pl.BlockSpec((bt, S, C), lambda b: (b, 0, 0))

    return pl.pallas_call(
        kernel,
        out_shape=out_shape,
        grid_spec=pltpu.PrefetchScalarGridSpec(
            num_scalar_prefetch=0,
            grid=(B // bt,),
            in_specs=in_specs,
            out_specs=out_spec,
        ),
        compiler_params=pltpu.CompilerParams(
            dimension_semantics=("parallel",),
            vmem_limit_bytes=vmem_limit),
    )


# ---------------------------------------------------------------------------
# Public wrapper: prepare parameters once, return a jitted forward(x).
# ---------------------------------------------------------------------------
def make_bi_attention_forward(w1, b1, gamma, beta, w2, b2):
    """Hoists parameter prep out of the per-call path; forward is jitted
    (one Pallas compile per distinct x.shape, cached by jax.jit)."""
    F, H = w1.shape
    C = w2.shape[1]
    Cp8 = _round_up(C, 8)

    b1_2d = jnp.asarray(b1).reshape(1, H)
    gamma_2d = jnp.asarray(gamma).reshape(1, H)
    beta_2d = jnp.asarray(beta).reshape(1, H)
    b2_2d = jnp.asarray(b2).reshape(1, C)
    # Transposed + sublane-padded fc params for the lane-dense output path.
    w2t_p = jnp.zeros((Cp8, H), w2.dtype).at[:C, :].set(jnp.asarray(w2).T)
    b2t_p = jnp.zeros((Cp8, 1), b2.dtype).at[:C, 0].set(jnp.asarray(b2))

    def forward(x):
        B, S, _ = x.shape
        bt, transposed, vmem_limit = _plan(B, S, F, H, C, Cp8)
        call = _build_pallas_call(B, S, F, H, C, Cp8, bt, transposed, vmem_limit)
        if transposed:
            out_t = call(x, w1, b1_2d, gamma_2d, beta_2d, w2t_p, b2t_p)
            return out_t[:C, :].T.reshape(B, S, C)
        return call(x, w1, b1_2d, gamma_2d, beta_2d, w2, b2_2d)

    return jax.jit(forward)


# ---------------------------------------------------------------------------
# Pure-JAX reference
# ---------------------------------------------------------------------------
def reference_forward(x, w1, b1, gamma, beta, w2, b2):
    h = x @ w1 + b1
    scores = jnp.einsum("bsd,btd->bst", h, h)
    attn = jax.nn.softmax(scores, axis=-1)
    attended = jnp.einsum("bst,btd->bsd", attn, h)
    y = attended + h
    mean = y.mean(-1, keepdims=True)
    var = ((y - mean) ** 2).mean(-1, keepdims=True)
    y_norm = (y - mean) / jnp.sqrt(var + 1e-5) * gamma + beta
    return y_norm @ w2 + b2


if __name__ == "__main__":
    input_size, hidden_size, num_classes = 16, 32, 4

    key = jax.random.PRNGKey(0)
    kx, k1, k2, k3, k4, kx2 = jax.random.split(key, 6)

    # Deterministic synthetic parameters (shapes match the nn.Module).
    w1 = jax.random.normal(k1, (input_size, hidden_size), dtype=jnp.float32) * 0.1
    b1 = jax.random.normal(k2, (hidden_size,), dtype=jnp.float32) * 0.1
    gamma = jnp.ones((hidden_size,), dtype=jnp.float32)
    beta = jnp.zeros((hidden_size,), dtype=jnp.float32)
    w2 = jax.random.normal(k3, (hidden_size, num_classes), dtype=jnp.float32) * 0.1
    b2 = jax.random.normal(k4, (num_classes,), dtype=jnp.float32) * 0.1

    forward = make_bi_attention_forward(w1, b1, gamma, beta, w2, b2)

    # Small shape from the module spec (exercises the compact-output path).
    B, S = 2, 8
    x = jax.random.normal(kx, (B, S, input_size), dtype=jnp.float32)
    out = jax.block_until_ready(forward(x))
    ref = reference_forward(x, w1, b1, gamma, beta, w2, b2)
    assert out.shape == (B, S, num_classes)
    assert jnp.allclose(out, ref, atol=5e-2, rtol=5e-2), float(
        jnp.max(jnp.abs(out - ref)))

    # Slightly larger shape exercising the lane-dense transposed-output path
    # (Bt*S is a multiple of 128) and a multi-element batch tile.
    B2, S2 = 4, 128
    x2 = jax.random.normal(kx2, (B2, S2, input_size), dtype=jnp.float32)
    out2 = jax.block_until_ready(forward(x2))
    ref2 = reference_forward(x2, w1, b1, gamma, beta, w2, b2)
    assert out2.shape == (B2, S2, num_classes)
    assert jnp.allclose(out2, ref2, atol=5e-2, rtol=5e-2), float(
        jnp.max(jnp.abs(out2 - ref2)))

    print("KERNEL_OK")
</pallas_src>

<mosaic_0001>
module attributes {stable_mosaic.version = 11 : i64} {
  func.func @_bi_attention_kernel(%arg0: i32, %arg1: memref<1x8x16xf32, #tpu.memory_space<vmem>>, %arg2: memref<16x32xf32, #tpu.memory_space<vmem>>, %arg3: memref<1x32xf32, #tpu.memory_space<vmem>>, %arg4: memref<1x32xf32, #tpu.memory_space<vmem>>, %arg5: memref<1x32xf32, #tpu.memory_space<vmem>>, %arg6: memref<32x4xf32, #tpu.memory_space<vmem>>, %arg7: memref<1x4xf32, #tpu.memory_space<vmem>>, %arg8: memref<1x8x4xf32, #tpu.memory_space<vmem>>) attributes {dimension_semantics = [#tpu.dimension_semantics<parallel>], iteration_bounds = array<i64: 2>, scalar_prefetch = 0 : i64, scratch_operands = 0 : i64, tpu.core_type = #tpu.core_type<tc>, window_params = [{transform_indices = @transform_0, window_bounds = array<i64: 1, 8, 16>}, {pipeline_mode = #tpu.pipeline_mode<synchronous>, transform_indices = @transform_1, window_bounds = array<i64: 16, 32>}, {pipeline_mode = #tpu.pipeline_mode<synchronous>, transform_indices = @transform_2, window_bounds = array<i64: 1, 32>}, {pipeline_mode = #tpu.pipeline_mode<synchronous>, transform_indices = @transform_3, window_bounds = array<i64: 1, 32>}, {pipeline_mode = #tpu.pipeline_mode<synchronous>, transform_indices = @transform_4, window_bounds = array<i64: 1, 32>}, {pipeline_mode = #tpu.pipeline_mode<synchronous>, transform_indices = @transform_5, window_bounds = array<i64: 32, 4>}, {pipeline_mode = #tpu.pipeline_mode<synchronous>, transform_indices = @transform_6, window_bounds = array<i64: 1, 4>}, {transform_indices = @transform_7, window_bounds = array<i64: 1, 8, 4>}]} {
    %c0 = arith.constant 0 : index
    %c0_0 = arith.constant 0 : index
    %c0_1 = arith.constant 0 : index
    %0 = vector.load %arg1[%c0, %c0_0, %c0_1] : memref<1x8x16xf32, #tpu.memory_space<vmem>>, vector<1x8x16xf32>
    %1 = vector.shape_cast %0 : vector<1x8x16xf32> to vector<8x16xf32>
    %2 = arith.truncf %1 : vector<8x16xf32> to vector<8x16xbf16>
    %c0_2 = arith.constant 0 : index
    %c0_3 = arith.constant 0 : index
    %3 = vector.load %arg2[%c0_2, %c0_3] : memref<16x32xf32, #tpu.memory_space<vmem>>, vector<16x32xf32>
    %4 = arith.truncf %3 : vector<16x32xf32> to vector<16x32xbf16>
    %cst = arith.constant dense<0.000000e+00> : vector<8x32xf32>
    %5 = tpu.matmul %2, %4, %cst {dimension_numbers = #tpu.dot_dimension_numbers<[1], [0], [0], [1], [0, 0, 1, 1], [], []>} : vector<8x16xbf16>, vector<16x32xbf16>, vector<8x32xf32> -> vector<8x32xf32>
    %c0_4 = arith.constant 0 : index
    %c0_5 = arith.constant 0 : index
    %6 = vector.load %arg3[%c0_4, %c0_5] : memref<1x32xf32, #tpu.memory_space<vmem>>, vector<1x32xf32>
    %7 = vector.broadcast %6 : vector<1x32xf32> to vector<8x32xf32>
    %8 = arith.addf %5, %7 : vector<8x32xf32>
    %9 = vector.shape_cast %8 : vector<8x32xf32> to vector<1x8x32xf32>
    %10 = arith.truncf %9 : vector<1x8x32xf32> to vector<1x8x32xbf16>
    %cst_6 = arith.constant dense<0.000000e+00> : vector<1x8x8xf32>
    %11 = tpu.matmul %10, %10, %cst_6 {dimension_numbers = #tpu.dot_dimension_numbers<[2], [2], [1], [1], [0, 0, 0, 1, 1, 1], [0], [0]>} : vector<1x8x32xbf16>, vector<1x8x32xbf16>, vector<1x8x8xf32> -> vector<1x8x8xf32>
    %cst_7 = arith.constant dense<0xFF800000> : vector<1x8xf32>
    %12 = vector.multi_reduction <maximumf>, %11, %cst_7 [2] : vector<1x8x8xf32> to vector<1x8xf32>
    %13 = vector.shape_cast %12 : vector<1x8xf32> to vector<1x8x1xf32>
    %14 = vector.broadcast %13 : vector<1x8x1xf32> to vector<1x8x8xf32>
    %15 = arith.subf %11, %14 : vector<1x8x8xf32>
    %16 = arith.truncf %15 : vector<1x8x8xf32> to vector<1x8x8xbf16>
    %17 = math.exp %16 : vector<1x8x8xbf16>
    %18 = arith.extf %17 : vector<1x8x8xbf16> to vector<1x8x8xf32>
    %cst_8 = arith.constant dense<0.000000e+00> : vector<1x8xf32>
    %19 = vector.multi_reduction <add>, %18, %cst_8 [2] : vector<1x8x8xf32> to vector<1x8xf32>
    %20 = vector.shape_cast %19 : vector<1x8xf32> to vector<1x8x1xf32>
    %cst_9 = arith.constant dense<0.000000e+00> : vector<1x8x32xf32>
    %21 = tpu.matmul %17, %10, %cst_9 {dimension_numbers = #tpu.dot_dimension_numbers<[2], [1], [1], [2], [0, 0, 0, 1, 1, 2], [0], [0]>} : vector<1x8x8xbf16>, vector<1x8x32xbf16>, vector<1x8x32xf32> -> vector<1x8x32xf32>
    %22 = tpu.reciprocal %20 {approx = true} : vector<1x8x1xf32> -> vector<1x8x1xf32>
    %23 = vector.broadcast %22 : vector<1x8x1xf32> to vector<1x8x32xf32>
    %24 = arith.mulf %21, %23 : vector<1x8x32xf32>
    %25 = arith.addf %24, %9 : vector<1x8x32xf32>
    %cst_10 = arith.constant dense<0.000000e+00> : vector<1x8xf32>
    %26 = vector.multi_reduction <add>, %25, %cst_10 [2] : vector<1x8x32xf32> to vector<1x8xf32>
    %27 = vector.shape_cast %26 : vector<1x8xf32> to vector<1x8x1xf32>
    %cst_11 = arith.constant 3.200000e+01 : f32
    %28 = vector.broadcast %cst_11 : f32 to vector<1x8x1xf32>
    %29 = arith.divf %27, %28 : vector<1x8x1xf32>
    %30 = vector.broadcast %29 : vector<1x8x1xf32> to vector<1x8x32xf32>
    %31 = arith.subf %25, %30 : vector<1x8x32xf32>
    %32 = arith.mulf %31, %31 : vector<1x8x32xf32>
    %cst_12 = arith.constant dense<0.000000e+00> : vector<1x8xf32>
    %33 = vector.multi_reduction <add>, %32, %cst_12 [2] : vector<1x8x32xf32> to vector<1x8xf32>
    %34 = vector.shape_cast %33 : vector<1x8xf32> to vector<1x8x1xf32>
    %cst_13 = arith.constant 3.200000e+01 : f32
    %35 = vector.broadcast %cst_13 : f32 to vector<1x8x1xf32>
    %36 = arith.divf %34, %35 : vector<1x8x1xf32>
    %cst_14 = arith.constant 9.99999974E-6 : f32
    %37 = vector.broadcast %cst_14 : f32 to vector<1x8x1xf32>
    %38 = arith.addf %36, %37 : vector<1x8x1xf32>
    %39 = math.rsqrt %38 : vector<1x8x1xf32>
    %40 = vector.broadcast %39 : vector<1x8x1xf32> to vector<1x8x32xf32>
    %41 = arith.mulf %31, %40 : vector<1x8x32xf32>
    %c0_15 = arith.constant 0 : index
    %c0_16 = arith.constant 0 : index
    %42 = vector.load %arg4[%c0_15, %c0_16] : memref<1x32xf32, #tpu.memory_space<vmem>>, vector<1x32xf32>
    %43 = vector.shape_cast %42 : vector<1x32xf32> to vector<1x1x32xf32>
    %44 = vector.broadcast %43 : vector<1x1x32xf32> to vector<1x8x32xf32>
    %45 = arith.mulf %41, %44 : vector<1x8x32xf32>
    %c0_17 = arith.constant 0 : index
    %c0_18 = arith.constant 0 : index
    %46 = vector.load %arg5[%c0_17, %c0_18] : memref<1x32xf32, #tpu.memory_space<vmem>>, vector<1x32xf32>
    %47 = vector.shape_cast %46 : vector<1x32xf32> to vector<1x1x32xf32>
    %48 = vector.broadcast %47 : vector<1x1x32xf32> to vector<1x8x32xf32>
    %49 = arith.addf %45, %48 : vector<1x8x32xf32>
    %50 = vector.shape_cast %49 : vector<1x8x32xf32> to vector<8x32xf32>
    %51 = arith.truncf %50 : vector<8x32xf32> to vector<8x32xbf16>
    %c0_19 = arith.constant 0 : index
    %c0_20 = arith.constant 0 : index
    %52 = vector.load %arg6[%c0_19, %c0_20] : memref<32x4xf32, #tpu.memory_space<vmem>>, vector<32x4xf32>
    %53 = arith.truncf %52 : vector<32x4xf32> to vector<32x4xbf16>
    %cst_21 = arith.constant dense<0.000000e+00> : vector<8x4xf32>
    %54 = tpu.matmul %51, %53, %cst_21 {dimension_numbers = #tpu.dot_dimension_numbers<[1], [0], [0], [1], [0, 0, 1, 1], [], []>} : vector<8x32xbf16>, vector<32x4xbf16>, vector<8x4xf32> -> vector<8x4xf32>
    %c0_22 = arith.constant 0 : index
    %c0_23 = arith.constant 0 : index
    %55 = vector.load %arg7[%c0_22, %c0_23] : memref<1x4xf32, #tpu.memory_space<vmem>>, vector<1x4xf32>
    %56 = vector.broadcast %55 : vector<1x4xf32> to vector<8x4xf32>
    %57 = arith.addf %54, %56 : vector<8x4xf32>
    %58 = vector.shape_cast %57 : vector<8x4xf32> to vector<1x8x4xf32>
    %c0_24 = arith.constant 0 : index
    %c0_25 = arith.constant 0 : index
    %c0_26 = arith.constant 0 : index
    %59 = vector.load %arg8[%c0_24, %c0_25, %c0_26] : memref<1x8x4xf32, #tpu.memory_space<vmem>>, vector<1x8x4xf32>
    tpu.vector_store %arg8[%c0_24, %c0_25, %c0_26], %58 {strides = array<i32>} : memref<1x8x4xf32, #tpu.memory_space<vmem>>, vector<1x8x4xf32>,
    return
  }
  func.func @transform_0(%arg0: i32) -> (i32, i32, i32) {
    %c0_i32 = arith.constant 0 : i32
    %c0_i32_0 = arith.constant 0 : i32
    %c0_i32_1 = arith.constant 0 : i32
    return %arg0, %c0_i32, %c0_i32_0 : i32, i32, i32
  }
  func.func @transform_1(%arg0: i32) -> (i32, i32) {
    %c0_i32 = arith.constant 0 : i32
    %c0_i32_0 = arith.constant 0 : i32
    %c0_i32_1 = arith.constant 0 : i32
    return %c0_i32, %c0_i32_0 : i32, i32
  }
  func.func @transform_2(%arg0: i32) -> (i32, i32) {
    %c0_i32 = arith.constant 0 : i32
    %c0_i32_0 = arith.constant 0 : i32
    %c0_i32_1 = arith.constant 0 : i32
    return %c0_i32, %c0_i32_0 : i32, i32
  }
  func.func @transform_3(%arg0: i32) -> (i32, i32) {
    %c0_i32 = arith.constant 0 : i32
    %c0_i32_0 = arith.constant 0 : i32
    %c0_i32_1 = arith.constant 0 : i32
    return %c0_i32, %c0_i32_0 : i32, i32
  }
  func.func @transform_4(%arg0: i32) -> (i32, i32) {
    %c0_i32 = arith.constant 0 : i32
    %c0_i32_0 = arith.constant 0 : i32
    %c0_i32_1 = arith.constant 0 : i32
    return %c0_i32, %c0_i32_0 : i32, i32
  }
  func.func @transform_5(%arg0: i32) -> (i32, i32) {
    %c0_i32 = arith.constant 0 : i32
    %c0_i32_0 = arith.constant 0 : i32
    %c0_i32_1 = arith.constant 0 : i32
    return %c0_i32, %c0_i32_0 : i32, i32
  }
  func.func @transform_6(%arg0: i32) -> (i32, i32) {
    %c0_i32 = arith.constant 0 : i32
    %c0_i32_0 = arith.constant 0 : i32
    %c0_i32_1 = arith.constant 0 : i32
    return %c0_i32, %c0_i32_0 : i32, i32
  }
  func.func @transform_7(%arg0: i32) -> (i32, i32, i32) {
    %c0_i32 = arith.constant 0 : i32
    %c0_i32_0 = arith.constant 0 : i32
    %c0_i32_1 = arith.constant 0 : i32
    return %arg0, %c0_i32, %c0_i32_0 : i32, i32, i32
  }
}

</mosaic_0001>

<bundles_post_ra>
// kernel: forward.1
= control target key start
LH: loop header
LB: loop body
LE: loop exit
PB: predicated region body
PF: predicated region fallthrough
CT: control target
= control target key end

     0   :  { %12 = vsyncpa [#allocation3], 0  ;;  %s1071_s0 = inlined_call_operand.hbm [shape: f32[2,8,16], index: 0, kind: input, shape index: {}]   ;;  %s1072_s1 = inlined_call_operand.vmem [shape: f32[16,32], index: 1, kind: input, shape index: {}]   ;;  %s1073_s2 = inlined_call_operand.vmem [shape: f32[1,32], index: 2, kind: input, shape index: {}]   ;;  %s1074_s3 = inlined_call_operand.vmem [shape: f32[1,32], index: 3, kind: input, shape index: {}]   ;;  %s1075_s4 = inlined_call_operand.vmem [shape: f32[1,32], index: 4, kind: input, shape index: {}]   ;;  %s1076_s5 = inlined_call_operand.hbm [shape: f32[32,4], index: 5, kind: input, shape index: {}]   ;;  %s1077_s6 = inlined_call_operand.vmem [shape: f32[1,4], index: 6, kind: input, shape index: {}]   ;;  %s1078_s7 = inlined_call_operand.vmem [shape: f32[2,8,4], index: 7, kind: output, shape index: {}]  }
   0x1   :  { %14 = vsyncpa [#allocation3 + $0x1], 0 }
   0x2   :  { %15 = vsyncpa [#allocation5], 0  ;;  %s896_s24 = smov 0   ;;  %s898_s25 = smov 0  }
   0x3   :  { %s900_s26 = smov 0   ;;  %s902_s27 = smov 0  }
   0x4 LB: > { %s915_s28 = sadd.s32 4294967295, %s848_s27   ;;  %p41_p0 = scmp.ne.s32.totalorder %s840_s25, %s836_s24  ;;  %s848_s27 = sphi %s902_s27, %s1093_s27   ;;  %s844_s26 = sphi %s900_s26, %s1092_s26   ;;  %s840_s25 = sphi %s898_s25, %s1091_s25   ;;  %s836_s24 = sphi %s896_s24, %s1090_s24  }
   0x5   : > { %p1079_p1 = scmp.eq.s32.totalorder %s915_s28, 0  ;;  %p638_p2 = scmp.ge.s32.totalorder %s848_s27, 1 }
   0x6   : > { %p204_p3 = scmp.lt.s32.totalorder %s848_s27, 3  ;;  %s850_s8 = smov [#allocation4]  }
   0x7   : > { %p923_p4 = por %p1079_p1, %p41_p0  ;;  %s228_s9 = sshll.u32 %s850_s8, 4  ;;  %s229_s9 = int_to_ptr.vmem [resolvable:$true] %s228_s9 }
   0x8   : > { %p927_p5 = pnand %p638_p2, %p204_p3  ;;  %s940_s11 = sadd.s32 1, %s848_s27  }
   0x9   : > { %s1082_s29 = scalar_select %p923_p4, 1, 0 }
   0xa   : > { %s1083_s30 = scalar_select %p927_p5, 1, 0 }
   0xb   : > { %p698_p6 = pneg %p927_p5  ;;  %s28_s12 = sadd.s32 1, %s844_s26 }
   0xc   : > { %s25_s13 = ssub.s32 %s848_s27, %s940_s11  ;;  %s752_s16 = scalar_lea.hbm %s1076_s5, 512 }
   0xd   : > { %p935_p7 = pnand %p698_p6, %p1079_p1  ;;  %p753_p8 = scmp.ne.s32.totalorder %s1076_s5, %s752_s16 }
   0xe   : > { %p759_p12 = scmp.lt.u32.totalorder %s752_s16, %s1076_s5 }
   0xf   : > { %p754_p9 = pneg %p935_p7 }
  0x11   : > { %p755_p10 = pnand %p754_p9, %p753_p8 }
  0x13   : > { %p756_p11 = pneg %p755_p10 }
  0x15   : > { %p761_p13 = pnand %p759_p12, %p756_p11 }
  0x17   : > { %764 = shalt.err (!%p761_p13)
}
  0x18   : > { %s765_s21 = scalar_lea.vmem %s229_s9, 512  ;;  %p773_p6 = scmp.lt.s32.totalorder %s229_s9, %s229_s9 }
  0x19   : > { %p766_p0 = scmp.ne.s32.totalorder %s229_s9, %s765_s21  ;;  %p774_p1 = scmp.lt.s32.totalorder %s765_s21, %s765_s21 }
  0x1b   : > { %p768_p2 = pnand %p766_p0, %p754_p9  ;;  %p775_p4 = por %p774_p1, %p773_p6 }
  0x1d   : > { %p769_p3 = pneg %p768_p2 }
  0x1f   : > { %p776_p5 = pnand %p775_p4, %p769_p3 }
  0x21   : > { %779 = shalt.err (!%p776_p5)
}
  0x22   : > { %s851_s22 = smov 128   ;;  %s852_s23 = smov 8  }
  0x23   : > { %701 = dma.hbm_to_vmem [thread:$0]  (!%p935_p7), %s1076_s5, 512, %s229_s9, [#allocation5], %s851_s22, %s851_s22, %s852_s23  }
  0x24   : > { %p26_p8 = scmp.eq.s32.totalorder %s25_s13, 0  ;;  %p35_p9 = scmp.ne.s32.totalorder %s844_s26, %s840_s25 }
  0x25   : > { %p36_p1 = scmp.eq.s32.totalorder %s848_s27, 0  ;;  %p707_p4 = scmp.lt.s32.totalorder %s848_s27, 2 }
  0x26   : > { %s966_s14 = scalar_select %p26_p8, %s844_s26, %s28_s12  }
  0x27   : > { %p37_p5 = por %p36_p1, %p35_p9  ;;  %s245_s15 = sand.u32 1, %s844_s26  }
  0x28   : > { %s641_s16 = sshll.u32 %s245_s15, 3  ;;  %s642_s17 = sshll.u32 %s848_s27, 7 }
  0x29   : > { %s973_s20 = scalar_lea.hbm %s1071_s0, %s642_s17  ;;  %s249_s9 = scalar_lea.vmem [#allocation2], %s641_s16 }
  0x2a   : > { %s256_s10 = sshll.u32 %s249_s9, 4  ;;  %p977_p7 = pnand %p707_p4, %p37_p5  ;;  %s975_s10 = int_to_ptr.vmem [resolvable:$true] %s256_s10 }
  0x2b   : > { %s246_s27 = scalar_lea.sflag [#allocation3], %s245_s15  ;;  %s780_s13 = scalar_lea.hbm %s973_s20, 128 }
  0x2c   : > { %p781_p10 = scmp.ne.s32.totalorder %s973_s20, %s780_s13  ;;  %p782_p11 = pneg %p977_p7 }
  0x2d   : > { %s785_s23 = scalar_lea.hbm %s1071_s0, 256  ;;  %p786_p0 = scmp.lt.u32.totalorder %s973_s20, %s1071_s0 }
  0x2e   : > { %p783_p12 = pnand %p782_p11, %p781_p10  ;;  %p787_p2 = scmp.lt.u32.totalorder %s785_s23, %s780_s13 }
  0x2f   : > { %p789_p6 = scmp.lt.u32.totalorder %s780_s13, %s973_s20 }
  0x30   : > { %p784_p13 = pneg %p783_p12  ;;  %p788_p3 = por %p787_p2, %p786_p0 }
  0x32   : > { %p790_p8 = por %p789_p6, %p788_p3 }
  0x34   : > { %p791_p9 = pnand %p790_p8, %p784_p13 }
  0x36   : > { %794 = shalt.err (!%p791_p9)
}
  0x37   : > { %s795_s15 = scalar_lea.vmem %s975_s10, 128  ;;  %s853_s16 = smov [#allocation2]  }
  0x38   : > { %p796_p1 = scmp.ne.s32.totalorder %s975_s10, %s795_s15  ;;  %s800_s17 = sshll.u32 %s853_s16, 4  ;;  %s801_s17 = int_to_ptr.vmem [resolvable:$false] %s800_s17 }
  0x39   : > { %s802_s18 = scalar_lea.vmem %s801_s17, 256  ;;  %p803_p10 = scmp.lt.s32.totalorder %s975_s10, %s801_s17 }
  0x3a   : > { %p798_p4 = pnand %p796_p1, %p782_p11  ;;  %p804_p12 = scmp.lt.s32.totalorder %s802_s18, %s795_s15 }
  0x3c   : > { %p799_p5 = pneg %p798_p4  ;;  %p805_p0 = por %p804_p12, %p803_p10 }
  0x3e   : > { %p806_p2 = pnand %p805_p0, %p799_p5 }
  0x40   : > { %809 = shalt.err (!%p806_p2)
}
  0x41   : > { %705 = dma.hbm_to_vmem [thread:$0]  (!%p977_p7), %s973_s20, 128, %s975_s10, %s246_s27  }
  0x42   : > { %p1086_p13 = scmp.ne.s32.totalorder %s1083_s30, 0 }
  0x43   : > { %s267_s19 = sand.u32 (!%p1086_p13), 1, %s840_s25   ;;  %p1087_p11 = scmp.ne.s32.totalorder (!%p1086_p13), %s1082_s29, 0 }
  0x44   : > { %265 = sbr.rel (%p1086_p13) target bundleno = 1428 (0x594), region = 48  ;;  %s644_s9 = sshll.u32 (!%p1086_p13), %s267_s19, 3 }
  0x45   : > { %s268_s13 = scalar_lea.sflag (!%p1086_p13), [#allocation3], %s267_s19  ;;  %s271_s21 = scalar_lea.vmem (!%p1086_p13), [#allocation2], %s644_s9 }
  0x4b   : > { %827 = dma.done.wait (%p1087_p11), %s268_s13, 128  }
  0x4c   : > { %829 = vsyncadd (%p1087_p11), %s268_s13, 4294967168  ;;  %p1088_p3 = scmp.eq.s32.totalorder %s915_s28, 0 }
  0x4e   : > { %831 = dma.done.wait (%p1088_p3), [#allocation5], 512   ;;  %p1089_p6 = pmov %p1088_p3 }
  0x4f   : > { %v854_v0 = vmov 0.0   ;;  %vm855_vm0 = vmmov 0   ;;  %v312_v1 = vld [vmem:[%s1072_s1] sm:$0xff]  ;;  %v313_v2 = vld [vmem:[%s1072_s1 + $0x8] sm:$0xff]  ;;  %vm322_vm1 = vcmask 130048   ;;  %vm367_vm2 = vcmask 261120  }
  0x50   : > { %833 = vsyncadd (%p1089_p6), [#allocation5], 4294966784  ;;  %666 = vmatprep.subr.bf16.mxu0 %v854_v0  ;;  %668 = vmatprep.mubr.msk.bf16.mxu0 %vm855_vm0, %v854_v0  ;;  %v310_v3 = vld [vmem:[%s271_s21] sm:$0xff]  ;;  %v314_v4 = vpack.c.bf16 %v313_v2, %v312_v1  ;;  %vm427_vm3 = vcmask 1043456   ;;  %vm411_vm4 = vcmask 64512   ;;  %v504_v41 = vld [vmem:[#allocation4] sm:$0xff] }
  0x51   : > { %672 = vmatprep.subr.bf16.mxu1 %v854_v0  ;;  %674 = vmatprep.mubr.msk.bf16.mxu1 %vm855_vm0, %v854_v0  ;;  %v311_v5 = vpack.c.bf16 %v310_v3, %v310_v3  ;;  %v647_v6 = vld [vmem:[%s1073_s2] ss:$0 sm:$0xff]  ;;  %v505_v42 = vld [vmem:[#allocation4 + $0x8] sm:$0xff]  ;;  %v507_v45 = vld [vmem:[#allocation4 + $0x18] sm:$0xff]  ;;  %p305_p7 = scmp.lt.s32.totalorder %s915_s28, 1  ;;  %vm560_vm5 = vcmask 31744  }
  0x52   : > { %667 = vmatpush3.bf16.msra.mxu0 %v314_v4  ;;  %v508_v43 = vpack.c.bf16 %v505_v42, %v504_v41  ;;  %v506_v44 = vld [vmem:[#allocation4 + $0x10] sm:$0xff] }
  0x53   : > { %678 = vmatprep.subr.bf16.mxu0 %v854_v0  ;;  %v509_v46 = vpack.c.bf16 %v507_v45, %v506_v44  ;;  %v651_v51 = vld [vmem:[%s1074_s3] ss:$0 sm:$0xff]  ;;  %s1095_s28 = smov (!%p305_p7, %s915_s28), 1 }
  0x54   : > { %v652_v53 = vld [vmem:[%s1075_s4] ss:$0 sm:$0xff]  ;;  %s646_s15 = sshll.u32 %s1095_s28, 3 }
  0x55   : > { %669 = vmatmul.mubr.msk.bf16.vlgmr.msra.gmra.mrb[0].mxu0 %vm322_vm1, %v311_v5  ;;  %v653_v57 = vld [vmem:[%s1077_s6] ss:$0 sm:$0xff]  ;;  %s308_s9 = scalar_lea.vmem %s1078_s7, %s646_s15 }
  0x56   : > { %680 = vmatprep.mubr.msk.bf16.mxu0 %vm855_vm0, %v854_v0 }
 0x128   : > { %v360_v7 = vpop.f32.mrb[0].mxu0 }
 0x129   : > { %v361_v8 = vadd.f32 %v647_v6, %v360_v7  ;;  %v670_v9 = vpop.f32.mrb[1].mxu0 }
 0x12a   : > { %v363_v10 = vpop.f32.mrb[2].mxu0 }
 0x12b   : > { %v366_v11 = vpack.c.bf16 %v361_v8, %v361_v8  ;;  %v671_v12 = vpop.f32.mrb[3].mxu0 }
 0x12d   : > { %v369_v13 = vsel %vm367_vm2, %v366_v11, 0  ;;  %v428_v14 = vsel %vm427_vm3, %v366_v11, 0 }
 0x12e   : > { %673 = vmatpush3.bf16.xpose.msra.mxu1 %v369_v13  ;;  %679 = vmatpush3.bf16.msra.mxu0 %v428_v14 }
 0x12f   : > { %684 = vmatprep.subr.bf16.mxu1 %v854_v0 }
 0x135   : > { %675 = vmatmul.mubr.msk.bf16.vlgmr.msra.gmra.mrb[0].mxu1 %vm367_vm2, %v366_v11 }
 0x136   : > { %688 = vmatprep.mubr.msk.bf16.mxu1 %vm855_vm0, %v854_v0  ;;  %685 = vmatpush3.bf16.msra.mxu1 %v508_v43 }
 0x137   : > { %686 = vmatprep.subr.bf16.mxu1 %v854_v0 }
 0x13a   : > { %687 = vmatpush3.bf16.msra.mxu1 %v509_v46 }
 0x208   : > { %v405_v15 = vpop.f32.mrb[0].mxu1 }
 0x209   : > { %v676_v16 = vpop.f32.mrb[1].mxu1  ;;  %v412_v17 = vsel %vm411_vm4, %v405_v15, -inf }
 0x20a   : > { %413 = vmax.xlane.f32.xlu0 %v412_v17  ;;  %v408_v18 = vpop.f32.mrb[2].mxu1 }
 0x20b   : > { %v677_v19 = vpop.f32.mrb[3].mxu1 }
 0x297   : > { %v414_v20 = vpop.xlane.xlu0 %413 }
 0x298   : > { %v415_v21 = vsub.f32 %v405_v15, %v414_v20 }
 0x29a   : > { %v416_v22 = vpack.c.bf16 %v415_v21, %v415_v21 }
 0x29c   : > { %v418_v23 = vmul.bf16 1069105081, %v416_v22 }
 0x29e   : > { %746 = vpow.bf16 %v418_v23 }
 0x2a9   : > { %v747_v24 = vpop.eup %746 }
 0x2aa   : > { %681 = vmatmul.mubr.msk.bf16.vlgmr.msra.gmra.mrb[4].mxu0 %vm411_vm4, %v747_v24  ;;  %v420_v25 = vunpack.c.l.bf16 %v747_v24 }
 0x2ac   : > { %v421_v26 = vsel %vm411_vm4, %v420_v25, 0.0 }
 0x2ad   : > { %422 = vadd.xlane.f32.xlu0 %v421_v26 }
 0x33a   : > { %v423_v27 = vpop.xlane.xlu0 %422 }
 0x33b   : > { %748 = vrcp.f32 %v423_v27 }
 0x345   : > { %v749_v28 = vpop.eup %748 }
 0x37d   : > { %v464_v29 = vpop.f32.mrb[4].mxu0 }
 0x37e   : > { %v471_v30 = vmul.f32 %v749_v28, %v464_v29  ;;  %v682_v31 = vpop.f32.mrb[5].mxu0 }
 0x37f   : > { %v467_v32 = vpop.f32.mrb[6].mxu0 }
 0x380   : > { %v683_v33 = vpop.f32.mrb[7].mxu0  ;;  %v472_v34 = vadd.f32 %v471_v30, %v361_v8 }
 0x382   : > { %v473_v35 = vsel %vm367_vm2, %v472_v34, 0.0 }
 0x383   : > { %474 = vadd.xlane.f32.xlu1 %v473_v35 }
 0x410   : > { %v475_v36 = vpop.xlane.xlu1 %474 }
 0x411   : > { %v477_v37 = vmul.f32 0.03125, %v475_v36 }
 0x413   : > { %v478_v38 = vsub.f32 %v472_v34, %v477_v37 }
 0x415   : > { %v479_v39 = vmul.f32 %v478_v38, %v478_v38 }
 0x417   : > { %v480_v40 = vsel %vm367_vm2, %v479_v39, 0.0 }
 0x418   : > { %481 = vadd.xlane.f32.xlu1 %v480_v40 }
 0x4a5   : > { %v482_v47 = vpop.xlane.xlu1 %481 }
 0x4a6   : > { %v483_v48 = vmul.f32 0.03125, %v482_v47 }
 0x4a8   : > { %v484_v49 = vadd.f32 1e-05, %v483_v48 }
 0x4aa   : > { %750 = vrsqrt.f32 %v484_v49 }
 0x4b4   : > { %v751_v50 = vpop.eup %750 }
 0x4b5   : > { %v486_v52 = vmul.f32 %v751_v50, %v478_v38 }
 0x4b7   : > { %v494_v54 = vmul.f32 %v651_v51, %v486_v52 }
 0x4b9   : > { %v502_v55 = vadd.f32 %v652_v53, %v494_v54 }
 0x4bb   : > { %v503_v56 = vpack.c.bf16 %v502_v55, %v502_v55 }
 0x4bd   : > { %689 = vmatmul.mubr.msk.bf16.vlgmr.msra.gmra.mrb[4].mxu1 %vm367_vm2, %v503_v56 }
 0x590   : > { %v554_v58 = vpop.f32.mrb[4].mxu1 }
 0x591   : > { %v555_v59 = vadd.f32 %v653_v57, %v554_v58  ;;  %v690_v60 = vpop.f32.mrb[5].mxu1 }
 0x592   : > { %v557_v61 = vpop.f32.mrb[6].mxu1 }
 0x593   : > { %561 = vst.msk [vmem:[%s308_s9] sm:$0xff] %vm560_vm5, %v555_v59  ;;  %v691_v62 = vpop.f32.mrb[7].mxu1 }
 0x594 PF: > { %p18_p8 = scmp.ge.s32.totalorder %s940_s11, 4   ;;  %s1090_s24 = smov %s840_s25 }
 0x595   : > { %s1091_s25 = smov %s844_s26  ;;  %s1092_s26 = smov %s966_s14 }
 0x596   : > { %s1093_s27 = smov %s940_s11  ;;  %20 = sbr.rel (!%p18_p8) target bundleno = 4 (0x4), region = 92 }
 0x59d   :  { %581 = vsyncpa [#allocation3], 1 }
 0x59e   :  { %583 = vsyncpa [#allocation3 + $0x1], 1 }
 0x59f   :  { %584 = vsyncpa [#allocation5], 1 }

</bundles_post_ra>
